<compile_context>
chip_gen: v5e
topology: v5e:2x2
jax: 0.10.0
libtpu: 0.0.40
codegen_flags: <defaults>
</compile_context>

<pallas_src>
import functools

import jax
import jax.numpy as jnp
from jax.experimental import pallas as pl
from jax.experimental.pallas import tpu as pltpu


def _round_up(x, m):
    return ((x + m - 1) // m) * m


# ---------------------------------------------------------------------------
# Path 1: table resident in VMEM, vectorized one-hot gather on the MXU.
# ---------------------------------------------------------------------------

def _onehot_gather_kernel(idx_ref, table_ref, out_ref):
    # idx_ref   : (1, TILE, 1) int32 block -- indices for this tile, laid out
    #             along sublanes so no in-kernel transpose is needed.
    # table_ref : (num_nodes, D) VMEM-resident table (constant index_map).
    # out_ref   : (TILE, D) output tile (lane-dense store).
    idx_col = idx_ref[0]                                   # (TILE, 1) int32
    tile = idx_col.shape[0]
    num_nodes = table_ref.shape[0]
    node_ids = jax.lax.broadcasted_iota(jnp.int32, (tile, num_nodes), 1)
    # Out-of-range / negative indices produce an all-zero one-hot row, so no
    # OOB VMEM read is possible with this formulation.
    onehot = jnp.where(idx_col == node_ids, 1.0, 0.0).astype(table_ref.dtype)
    out_ref[...] = jnp.dot(
        onehot, table_ref[...], preferred_element_type=jnp.float32
    ).astype(out_ref.dtype)


def _embedding_resident(flat_idx, table, tile):
    n = flat_idx.shape[0]
    num_nodes, dim = table.shape
    n_tiles = pl.cdiv(n, tile)
    n_pad = n_tiles * tile
    # Only the (tiny) index vector is padded; the output is exactly (n, dim)
    # and the partial last block is masked on write-back -> no out[:n] copy.
    idx = jnp.pad(flat_idx, (0, n_pad - n)).reshape(n_tiles, tile, 1)

    return pl.pallas_call(
        _onehot_gather_kernel,
        out_shape=jax.ShapeDtypeStruct((n, dim), table.dtype),
        grid=(n_tiles,),
        in_specs=[
            pl.BlockSpec((1, tile, 1), lambda i: (i, 0, 0)),     # per-tile idx
            pl.BlockSpec((num_nodes, dim), lambda i: (0, 0)),    # resident table
        ],
        out_specs=pl.BlockSpec((tile, dim), lambda i: (i, 0)),
        compiler_params=pltpu.CompilerParams(
            # Tiles are independent -> shard the grid across both TCs on v7x.
            dimension_semantics=("parallel",),
            # Raise the scoped VMEM limit (v5e default is only 16 MiB) while
            # staying under v7x's 64 MiB physical VMEM per TensorCore.
            vmem_limit_bytes=48 * 1024 * 1024,
        ),
    )(idx, table)


# ---------------------------------------------------------------------------
# Path 2: table left in HBM, scalar-prefetch index_map drives pipelined DMA.
# ---------------------------------------------------------------------------

def _dma_gather_kernel(n_lookups, num_nodes, rows_per_step,
                       idx_smem, group_ref, out_ref):
    # idx_smem  : (n,) int32 in SMEM (scalar-prefetched indices)
    # group_ref : (8, D) block = the 8-row-aligned group containing the row
    # out_ref   : (rows_per_step, D) tile, resident across the inner grid axis
    i = pl.program_id(0)
    r = pl.program_id(1)
    p = jnp.minimum(i * rows_per_step + r, n_lookups - 1)    # tail guard
    node = jnp.clip(idx_smem[p], 0, num_nodes - 1)           # OOB guard
    sub = node % 8                                           # row within group
    out_ref[pl.ds(r, 1), :] = group_ref[pl.ds(sub, 1), :]


def _embedding_dma(flat_idx, table, rows_per_step):
    n = flat_idx.shape[0]
    num_nodes, dim = table.shape
    n_outer = pl.cdiv(n, rows_per_step)

    def group_map(i, r, idx_ref):
        p = jnp.minimum(i * rows_per_step + r, n - 1)
        node = jnp.clip(idx_ref[p], 0, num_nodes - 1)
        return (node // 8, 0)          # block index of the 8-row group

    kernel = functools.partial(_dma_gather_kernel, n, num_nodes, rows_per_step)

    return pl.pallas_call(
        kernel,
        out_shape=jax.ShapeDtypeStruct((n, dim), table.dtype),
        grid_spec=pltpu.PrefetchScalarGridSpec(
            num_scalar_prefetch=1,                 # indices land in SMEM
            grid=(n_outer, rows_per_step),
            in_specs=[
                # One sublane-aligned 8-row group of the table per inner step,
                # DMA'd (double-buffered / pipelined) from HBM.
                pl.BlockSpec((8, dim), group_map),
            ],
            # Output tile stays resident in VMEM across the inner axis and is
            # written back to HBM once per outer step (large lane-dense store).
            out_specs=pl.BlockSpec((rows_per_step, dim),
                                   lambda i, r, idx_ref: (i, 0)),
        ),
        compiler_params=pltpu.CompilerParams(
            dimension_semantics=("parallel", "arbitrary")),
    )(flat_idx, table)


# ---------------------------------------------------------------------------
# Wrapper (== nn.Embedding(num_nodes, D).forward)
# ---------------------------------------------------------------------------

_RESIDENT_TILE = 256            # lookups gathered per grid step (resident path)
_DMA_ROWS = 64                  # output rows per outer step (dma path)
_VMEM_BUDGET = 36 * 1024 * 1024
_MAX_ONEHOT_NODES = 4096        # one-hot work is O(num_nodes) per lookup


def embedding_lookup(indices, table, *, impl=None):
    """Pallas equivalent of torch.nn.Embedding(num_nodes, D)(indices)."""
    num_nodes, dim = table.shape
    orig_shape = indices.shape
    flat = indices.reshape(-1).astype(jnp.int32)
    n = flat.shape[0]

    tile = min(_RESIDENT_TILE, _round_up(n, 8))
    if impl is None:
        itemsize = jnp.dtype(table.dtype).itemsize
        est = (2 * num_nodes * dim * itemsize     # table (worst-case dbl-buffered)
               + 2 * tile * dim * 4               # output tile (dbl-buffered)
               + 2 * tile * 128 * 4               # lane-padded index block
               + tile * max(num_nodes, 128) * 4)  # one-hot intermediate
        impl = ("resident"
                if (num_nodes <= _MAX_ONEHOT_NODES and est <= _VMEM_BUDGET)
                else "dma")

    if impl == "resident":
        out = _embedding_resident(flat, table, tile)
    elif impl == "dma":
        rows = min(_DMA_ROWS, _round_up(n, 8))
        out = _embedding_dma(flat, table, rows)
    else:
        raise ValueError(f"unknown impl: {impl}")

    return out.reshape(*orig_shape, dim)


if __name__ == "__main__":
    num_nodes, embedding_dim = 64, 128
    B, S = 2, 8

    key = jax.random.PRNGKey(0)
    k_idx, k_w = jax.random.split(key)

    # nn.Embedding default init: N(0, 1), float32.
    table = jax.random.normal(k_w, (num_nodes, embedding_dim), dtype=jnp.float32)
    x = jax.random.randint(k_idx, (B, S), 0, num_nodes, dtype=jnp.int32)

    ref = jnp.take(table, x, axis=0)

    # Fast path (auto-selected here): resident table + vectorized MXU gather.
    out = embedding_lookup(x, table)
    out = jax.block_until_ready(out)
    assert out.shape == (B, S, embedding_dim), out.shape
    assert out.dtype == jnp.float32
    assert jnp.allclose(out, ref, rtol=1e-4, atol=1e-4), "resident path mismatch"

    # Large-table path: table stays in HBM, index_map-driven pipelined DMA.
    out_dma = embedding_lookup(x, table, impl="dma")
    out_dma = jax.block_until_ready(out_dma)
    assert out_dma.shape == (B, S, embedding_dim)
    assert jnp.allclose(out_dma, ref), "dma path mismatch"

    print("KERNEL_OK")
</pallas_src>

<mosaic_0001>
module attributes {stable_mosaic.version = 11 : i64} {
  func.func @_onehot_gather_kernel(%arg0: i32, %arg1: memref<1x16x1xi32, #tpu.memory_space<vmem>>, %arg2: memref<64x128xf32, #tpu.memory_space<vmem>>, %arg3: memref<16x128xf32, #tpu.memory_space<vmem>>) attributes {dimension_semantics = [#tpu.dimension_semantics<parallel>], iteration_bounds = array<i64: 1>, scalar_prefetch = 0 : i64, scratch_operands = 0 : i64, tpu.core_type = #tpu.core_type<tc>, window_params = [{transform_indices = @transform_0, window_bounds = array<i64: 1, 16, 1>}, {pipeline_mode = #tpu.pipeline_mode<synchronous>, transform_indices = @transform_1, window_bounds = array<i64: 64, 128>}, {transform_indices = @transform_2, window_bounds = array<i64: 16, 128>}]} {
    %c0 = arith.constant 0 : index
    %c0_0 = arith.constant 0 : index
    %c0_1 = arith.constant 0 : index
    %0 = vector.load %arg1[%c0, %c0_0, %c0_1] : memref<1x16x1xi32, #tpu.memory_space<vmem>>, vector<1x16x1xi32>
    %1 = vector.shape_cast %0 : vector<1x16x1xi32> to vector<16x1xi32>
    %2 = tpu.iota {dimensions = array<i32: 1>} : vector<16x64xi32>
    %3 = vector.broadcast %1 : vector<16x1xi32> to vector<16x64xi32>
    %4 = arith.cmpi eq, %3, %2 : vector<16x64xi32>
    %cst = arith.constant 1.000000e+00 : f32
    %cst_2 = arith.constant 0.000000e+00 : f32
    %5 = vector.broadcast %cst : f32 to vector<16x64xf32>
    %6 = vector.broadcast %cst_2 : f32 to vector<16x64xf32>
    %7 = arith.select %4, %5, %6 : vector<16x64xi1>, vector<16x64xf32>
    %c0_3 = arith.constant 0 : index
    %c0_4 = arith.constant 0 : index
    %8 = vector.load %arg2[%c0_3, %c0_4] : memref<64x128xf32, #tpu.memory_space<vmem>>, vector<64x128xf32>
    %cst_5 = arith.constant dense<0.000000e+00> : vector<16x128xf32>
    %9 = tpu.matmul %7, %8, %cst_5 {dimension_numbers = #tpu.dot_dimension_numbers<[1], [0], [0], [1], [0, 0, 1, 1], [], []>} : vector<16x64xf32>, vector<64x128xf32>, vector<16x128xf32> -> vector<16x128xf32>
    %c0_6 = arith.constant 0 : index
    %c0_7 = arith.constant 0 : index
    %10 = vector.load %arg3[%c0_6, %c0_7] : memref<16x128xf32, #tpu.memory_space<vmem>>, vector<16x128xf32>
    tpu.vector_store %arg3[%c0_6, %c0_7], %9 {strides = array<i32>} : memref<16x128xf32, #tpu.memory_space<vmem>>, vector<16x128xf32>,
    return
  }
  func.func @transform_0(%arg0: i32) -> (i32, i32, i32) {
    %c0_i32 = arith.constant 0 : i32
    %c0_i32_0 = arith.constant 0 : i32
    %c0_i32_1 = arith.constant 0 : i32
    return %arg0, %c0_i32, %c0_i32_0 : i32, i32, i32
  }
  func.func @transform_1(%arg0: i32) -> (i32, i32) {
    %c0_i32 = arith.constant 0 : i32
    %c0_i32_0 = arith.constant 0 : i32
    %c0_i32_1 = arith.constant 0 : i32
    return %c0_i32, %c0_i32_0 : i32, i32
  }
  func.func @transform_2(%arg0: i32) -> (i32, i32) {
    %c0_i32 = arith.constant 0 : i32
    %c0_i32_0 = arith.constant 0 : i32
    return %arg0, %c0_i32 : i32, i32
  }
}

</mosaic_0001>

<bundles_post_ra>
// kernel: tpu_custom_call.1
= control target key start
LH: loop header
LB: loop body
LE: loop exit
PB: predicated region body
PF: predicated region fallthrough
CT: control target
= control target key end

     0   :  { %7 = vsyncpa [#allocation3], 0  ;;  %s209_s0 = inlined_call_operand.vmem [shape: s32[1,16,1], index: 0, kind: input, shape index: {}]   ;;  %s210_s1 = inlined_call_operand.hbm [shape: f32[64,128], index: 1, kind: input, shape index: {}]   ;;  %s211_s2 = inlined_call_operand.hbm [shape: f32[16,128], index: 2, kind: output, shape index: {}]  }
   0x1   :  { %8 = vsyncpa [#allocation4], 0  ;;  %s15_s11 = sshll.u32 %s210_s1, 4  ;;  %s170_s12 = smov [#allocation2]   ;;  %s16_s11 = int_to_ptr.hbm [resolvable:$true] %s15_s11 }
   0x2   :  { %s17_s13 = sshll.u32 %s170_s12, 4  ;;  %s171_s14 = smov 128   ;;  %s18_s13 = int_to_ptr.vmem [resolvable:$true] %s17_s13 }
   0x3   :  { %s172_s15 = smov 8  }
   0x4   :  { %23 = dma.hbm_to_vmem [thread:$0]  %s16_s11, 1024, %s18_s13, [#allocation3], %s171_s14, %s171_s14, %s172_s15  }
   0x5   :  { %166 = dma.done.wait [#allocation3], 1024  }
   0x6   :  { %167 = vsyncadd [#allocation3], 4294966272  ;;  %v173_v0 = vmov 0   ;;  %v28_v1 = vld [vmem:[%s209_s0] sm:$0xff]  ;;  %v49_v2 = vld [vmem:[#allocation2 + $0x38] sm:$0xff]  ;;  %v30_v11 = vlaneseq  ;;  %vm50_vm0 = vcmask 523264  }
   0x7   :  { %117 = vset.pattern.permute.xlu0 %v173_v0  ;;  %65 = vmatpush.msra.mxu0 %v49_v2  ;;  %v48_v3 = vld [vmem:[#allocation2 + $0x30] sm:$0xff]  ;;  %v47_v4 = vld [vmem:[#allocation2 + $0x28] sm:$0xff]  ;;  %v46_v5 = vld [vmem:[#allocation2 + $0x20] sm:$0xff]  ;;  %v174_v14 = vmov 0.0   ;;  %s88_s22 = sshll.u32 %s211_s2, 4  ;;  %s89_s22 = int_to_ptr.hbm [resolvable:$true] %s88_s22 }
   0x8   :  { %33 = vperm.xlu0 %117, %v28_v1   ;;  %103 = vmatpush.msra.mxu1 %v49_v2  ;;  %v29_v6 = vld [vmem:[%s209_s0 + $0x8] sm:$0xff]  ;;  %v45_v7 = vld [vmem:[#allocation2 + $0x18] sm:$0xff]  ;;  %v44_v8 = vld [vmem:[#allocation2 + $0x10] sm:$0xff]  ;;  %v31_v12 = vand.u32 127, %v30_v11  ;;  %s175_s0 = smov [#allocation5]  }
   0x9   :  { %66 = vmatpush.msra.mxu0 %v48_v3  ;;  %v43_v9 = vld [vmem:[#allocation2 + $0x8] sm:$0xff]  ;;  %v42_v10 = vld [vmem:[#allocation2] sm:$0xff]  ;;  %s86_s19 = sshll.u32 %s175_s0, 4  ;;  %s87_s19 = int_to_ptr.vmem [resolvable:$true] %s86_s19 }
   0xa   :  { %104 = vmatpush.msra.mxu1 %v48_v3 }
   0xb   :  { %67 = vmatpush.msra.mxu0 %v47_v4 }
   0xc   :  { %105 = vmatpush.msra.mxu1 %v47_v4 }
   0xd   :  { %68 = vmatpush.msra.mxu0 %v46_v5 }
   0xe   :  { %106 = vmatpush.msra.mxu1 %v46_v5 }
   0xf   :  { %69 = vmatpush.msra.mxu0 %v45_v7 }
  0x10   :  { %36 = vperm.xlu0 %117, %v29_v6   ;;  %107 = vmatpush.msra.mxu1 %v45_v7 }
  0x11   :  { %70 = vmatpush.msra.mxu0 %v44_v8 }
  0x12   :  { %108 = vmatpush.msra.mxu1 %v44_v8 }
  0x13   :  { %71 = vmatpush.msra.mxu0 %v43_v9 }
  0x14   :  { %109 = vmatpush.msra.mxu1 %v43_v9 }
  0x15   :  { %72 = vmatpush.msra.mxu0 %v42_v10 }
  0x16   :  { %110 = vmatpush.msra.mxu1 %v42_v10 }
  0x7a   :  { %v34_v13 = vpop.permute.xlu0 %33 }
  0x7b   :  { %vm38_vm1 = vcmp.eq.s32.totalorder %v34_v13, %v31_v12 }
  0x7c   :  { %v40_v15 = vsel %vm38_vm1, 1.0, %v174_v14 }
  0x7d   :  { %101 = vmatmul.msk.f32.vlgmr.msra.gmra.mxu0 %vm50_vm0, %v40_v15 }
  0x82   :  { %v37_v16 = vpop.permute.xlu0 %36 }
  0x83   :  { %vm39_vm2 = vcmp.eq.s32.totalorder %v37_v16, %v31_v12 }
  0x84   :  { %v41_v17 = vsel %vm39_vm2, 1.0, %v174_v14 }
  0x85   :  { %102 = vmatmul.msk.f32.vlgmr.msra.gmra.mxu1 %vm50_vm0, %v41_v17 }
  0xfa   :  { %v74_v18 = vpop.f32.mrf.mxu0 }
  0xfb   :  { %80 = vst [vmem:[#allocation5] sm:$0xff] %v74_v18 }
 0x102   :  { %v77_v19 = vpop.f32.mrf.mxu1 }
 0x103   :  { %81 = vst [vmem:[#allocation5 + $0x8] sm:$0xff] %v77_v19 }
 0x104   :  { %94 = dma.vmem_to_hbm [thread:$0]  %s87_s19, 256, %s89_s22, [#allocation4], %s171_s14, %s171_s14, %s172_s15  }
 0x105   :  { %168 = dma.done.wait [#allocation4], 256  }
 0x106   :  { %169 = vsyncadd [#allocation4], 4294967040 }
 0x107   :  { %99 = vsyncpa [#allocation3], 1 }
 0x108   :  { %100 = vsyncpa [#allocation4], 1 }

</bundles_post_ra>
